<compile_context>
chip_gen: v7x
topology: tpu7x:2x2x1
jax: 0.10.0
libtpu: 0.0.40
codegen_flags: <defaults>
</compile_context>

<pallas_src>
import jax
import jax.numpy as jnp
from jax.experimental import pallas as pl
from jax.experimental.pallas import tpu as pltpu

BN_EPS = 1e-5


# --------------------------------------------------------------------------- kernels

def _ms_cam_fused_kernel(x_ref, w1_ref, b1_ref, w2_ref, b2_ref,
                         g1_ref, gb1_ref, g2_ref, gb2_ref, o_ref):
    # Block shapes (leading batch dim squeezed):
    #   x_ref : (C, HW)  -- full per-batch slab, spatial on the lane axis
    #   w1/g1 : (Ci, C), b1/gb1: (Ci, 1), w2/g2: (C, Ci), b2/gb2: (C, 1)   (BN folded)
    x = x_ref[...]                                                        # (C, HW)
    C, HW = x.shape

    # ---- global branch: AdaptiveAvgPool2d(1) -> conv -> BN -> ReLU -> conv -> BN ----
    m = jnp.sum(x, axis=1, keepdims=True) * (1.0 / HW)                    # (C, 1)
    mb = jnp.broadcast_to(m, (C, 128))                                    # lane-broadcast to MXU tile
    hg = jnp.maximum(
        jnp.dot(g1_ref[...], mb, preferred_element_type=jnp.float32) + gb1_ref[...], 0.0)   # (Ci, 128)
    xg = (jnp.dot(g2_ref[...], hg, preferred_element_type=jnp.float32) + gb2_ref[...])[:, 0:1]  # (C, 1)

    # ---- local branch: conv -> BN -> ReLU -> conv -> BN ----
    h = jnp.maximum(
        jnp.dot(w1_ref[...], x, preferred_element_type=jnp.float32) + b1_ref[...], 0.0)     # (Ci, HW)
    xl = jnp.dot(w2_ref[...], h, preferred_element_type=jnp.float32) + b2_ref[...]          # (C, HW)

    # gate = sigmoid(local + global) applied elementwise to x (single read + single write of x)
    wei = jax.nn.sigmoid(xl + xg)                                         # (C, HW)
    o_ref[...] = (x_ref[...] * wei).astype(o_ref.dtype)


def _ms_cam_local_kernel(xg_ref, x_ref, w1_ref, b1_ref, w2_ref, b2_ref, o_ref):
    # Tiled fallback.  Block shapes (leading batch dim squeezed):
    #   x_ref : (C, T)   -- T spatial positions on the lane axis
    #   xg_ref: (C, 1)   -- per-batch global-branch logits (computed in the wrapper)
    x = x_ref[...]                                                        # (C, T)

    h = jnp.dot(w1_ref[...], x, preferred_element_type=jnp.float32) + b1_ref[...]   # (Ci, T)
    h = jnp.maximum(h, 0.0)
    xl = jnp.dot(w2_ref[...], h, preferred_element_type=jnp.float32) + b2_ref[...]  # (C, T)

    wei = jax.nn.sigmoid(xl + xg_ref[...])                                # (C, T)
    o_ref[...] = (x_ref[...] * wei).astype(o_ref.dtype)


# --------------------------------------------------------------------------- glue

def _fold_bn(w, b, gamma, beta, mean, var):
    """Fold eval-mode BatchNorm into a 1x1 conv expressed as x @ w + b.

    w: (Cin, Cout), b: (Cout,)  ->  returns (w_eff, b_eff) with same shapes.
    """
    scale = gamma / jnp.sqrt(var + BN_EPS)          # (Cout,)
    w_eff = w * scale[None, :]
    b_eff = b * scale + (beta - mean * scale)
    return w_eff, b_eff


def _pick_hw_tile(hw, max_tile=2048):
    """Largest multiple-of-128 divisor of hw (capped), preferring >=2 tiles per batch."""
    cands = [t for t in range(128, min(hw, max_tile) + 1, 128) if hw % t == 0]
    if not cands:
        return hw                      # hw < 128 (or awkward): single full-extent block
    multi = [t for t in cands if hw // t >= 2]
    return max(multi) if multi else max(cands)


def ms_cam_forward(x_nchw, params, *, hw_tile=None, fused_slab_limit_bytes=2 * 1024 * 1024):
    """x_nchw: (N, C, H, W) float32. params: dict of BN-folded weights/biases."""
    N, C, H, W = x_nchw.shape
    HW = H * W
    Ci = params["w1"].shape[1]

    # Native layout, no transpose: (N, C, HW). C -> sublanes, HW -> lanes.
    x = x_nchw.reshape(N, C, HW)

    # Weights pre-transposed for (C, HW)-layout matmuls; biases as column vectors.
    w1t = params["w1"].T                      # (Ci, C)
    b1 = params["b1"].reshape(Ci, 1)
    w2t = params["w2"].T                      # (C, Ci)
    b2 = params["b2"].reshape(C, 1)
    g1t = params["g1"].T                      # (Ci, C)
    gb1 = params["gb1"].reshape(Ci, 1)
    g2t = params["g2"].T                      # (C, Ci)
    gb2 = params["gb2"].reshape(C, 1)

    slab_bytes = C * HW * x.dtype.itemsize

    if hw_tile is None and slab_bytes <= fused_slab_limit_bytes:
        # ---------------- fully fused path: 1 HBM read + 1 HBM write of x ----------------
        const = lambda shape: pl.BlockSpec(shape, lambda n: (0,) * len(shape))
        out = pl.pallas_call(
            _ms_cam_fused_kernel,
            out_shape=jax.ShapeDtypeStruct((N, C, HW), x.dtype),
            grid=(N,),
            in_specs=[
                pl.BlockSpec((None, C, HW), lambda n: (n, 0, 0)),   # full per-batch slab
                const((Ci, C)), const((Ci, 1)),                     # local conv1 (BN-folded)
                const((C, Ci)), const((C, 1)),                      # local conv2 (BN-folded)
                const((Ci, C)), const((Ci, 1)),                     # global conv1 (BN-folded)
                const((C, Ci)), const((C, 1)),                      # global conv2 (BN-folded)
            ],
            out_specs=pl.BlockSpec((None, C, HW), lambda n: (n, 0, 0)),
            compiler_params=pltpu.CompilerParams(
                dimension_semantics=("parallel",)),
        )(x, w1t, b1, w2t, b2, g1t, gb1, g2t, gb2)
        return out.reshape(N, C, H, W)

    # ---------------- tiled fallback (large feature maps) ----------------
    # Global branch hoisted out of the hot per-tile body: per-batch, C-sized work.
    m = jnp.mean(x, axis=2)                                               # (N, C)
    hg = jnp.maximum(m @ params["g1"] + params["gb1"][None, :], 0.0)      # (N, Ci)
    xg = (hg @ params["g2"] + params["gb2"][None, :])[:, :, None]         # (N, C, 1)
    xg = xg.astype(jnp.float32)

    T = hw_tile if hw_tile is not None else _pick_hw_tile(HW)
    assert HW % T == 0, "hw tile must divide H*W"
    grid = (N, HW // T)

    const = lambda shape: pl.BlockSpec(shape, lambda n, t: (0,) * len(shape))

    out = pl.pallas_call(
        _ms_cam_local_kernel,
        out_shape=jax.ShapeDtypeStruct((N, C, HW), x.dtype),
        grid=grid,
        in_specs=[
            pl.BlockSpec((None, C, 1), lambda n, t: (n, 0, 0)),   # xg: per-batch gate term
            pl.BlockSpec((None, C, T), lambda n, t: (n, 0, t)),   # x tile (lane-dense)
            const((Ci, C)), const((Ci, 1)),                       # local conv1 (BN-folded)
            const((C, Ci)), const((C, 1)),                        # local conv2 (BN-folded)
        ],
        out_specs=pl.BlockSpec((None, C, T), lambda n, t: (n, 0, t)),
        compiler_params=pltpu.CompilerParams(
            dimension_semantics=("parallel", "parallel")),
    )(xg, x, w1t, b1, w2t, b2)

    return out.reshape(N, C, H, W)


def make_params(key, channels=4, r=2):
    """Deterministic synthetic parameters for MS_CAM (conv weights + eval-mode BN stats),
    with BN folded into the 1x1 convs."""
    Ci = max(int(channels // r), 1)
    # 4 convs x 2 keys + 4 BNs x 4 keys = 24 keys total.
    kit = iter(jax.random.split(key, 24))

    def conv(cin, cout):
        w = jax.random.normal(next(kit), (cin, cout), jnp.float32) * 0.1
        b = jax.random.normal(next(kit), (cout,), jnp.float32) * 0.1
        return w, b

    def bn(c):
        gamma = 1.0 + 0.1 * jax.random.normal(next(kit), (c,), jnp.float32)
        beta = 0.1 * jax.random.normal(next(kit), (c,), jnp.float32)
        mean = 0.1 * jax.random.normal(next(kit), (c,), jnp.float32)
        var = jnp.abs(jax.random.normal(next(kit), (c,), jnp.float32)) + 0.5
        return gamma, beta, mean, var

    # local branch
    w1, b1 = conv(channels, Ci)
    w1, b1 = _fold_bn(w1, b1, *bn(Ci))
    w2, b2 = conv(Ci, channels)
    w2, b2 = _fold_bn(w2, b2, *bn(channels))
    # global branch
    g1, gb1 = conv(channels, Ci)
    g1, gb1 = _fold_bn(g1, gb1, *bn(Ci))
    g2, gb2 = conv(Ci, channels)
    g2, gb2 = _fold_bn(g2, gb2, *bn(channels))

    return dict(w1=w1, b1=b1, w2=w2, b2=b2, g1=g1, gb1=gb1, g2=g2, gb2=gb2)


def ms_cam_reference(x_nchw, params):
    """Pure-JAX reference of the same (BN-folded, eval-mode) forward pass."""
    N, C, H, W = x_nchw.shape
    x = jnp.transpose(x_nchw, (0, 2, 3, 1)).reshape(N, H * W, C)
    xl = jnp.maximum(x @ params["w1"] + params["b1"], 0.0) @ params["w2"] + params["b2"]
    m = jnp.mean(x, axis=1, keepdims=True)
    xg = jnp.maximum(m @ params["g1"] + params["gb1"], 0.0) @ params["g2"] + params["gb2"]
    out = x * jax.nn.sigmoid(xl + xg)
    return jnp.transpose(out.reshape(N, H, W, C), (0, 3, 1, 2))


if __name__ == "__main__":
    # Keep all f32 matmuls at full precision so kernel and reference agree tightly.
    jax.config.update("jax_default_matmul_precision", "highest")

    key = jax.random.PRNGKey(0)
    k_x, k_p = jax.random.split(key)

    N, C, H, W = 2, 4, 16, 16        # channels=4, r=2 -> inter_channels=2
    x = jax.random.normal(k_x, (N, C, H, W), jnp.float32)
    params = make_params(k_p, channels=C, r=2)

    ref = ms_cam_reference(x, params)

    # Fused path (global branch + pooling inside the kernel; single read of x).
    out_fused = jax.block_until_ready(ms_cam_forward(x, params))
    assert out_fused.shape == x.shape
    assert jnp.allclose(out_fused, ref, atol=1e-4, rtol=1e-4), "fused kernel mismatch vs. reference"

    # Tiled fallback path (forced), used for feature maps too large to keep in VMEM.
    out_tiled = jax.block_until_ready(ms_cam_forward(x, params, hw_tile=128))
    assert jnp.allclose(out_tiled, ref, atol=1e-4, rtol=1e-4), "tiled kernel mismatch vs. reference"

    print("KERNEL_OK")
</pallas_src>

<mosaic_0001>
module attributes {stable_mosaic.version = 11 : i64} {
  func.func @_ms_cam_fused_kernel(%arg0: i32, %arg1: memref<1x4x256xf32, #tpu.memory_space<vmem>>, %arg2: memref<2x4xf32, #tpu.memory_space<vmem>>, %arg3: memref<2x1xf32, #tpu.memory_space<vmem>>, %arg4: memref<4x2xf32, #tpu.memory_space<vmem>>, %arg5: memref<4x1xf32, #tpu.memory_space<vmem>>, %arg6: memref<2x4xf32, #tpu.memory_space<vmem>>, %arg7: memref<2x1xf32, #tpu.memory_space<vmem>>, %arg8: memref<4x2xf32, #tpu.memory_space<vmem>>, %arg9: memref<4x1xf32, #tpu.memory_space<vmem>>, %arg10: memref<1x4x256xf32, #tpu.memory_space<vmem>>) attributes {dimension_semantics = [#tpu.dimension_semantics<parallel>], iteration_bounds = array<i64: 2>, scalar_prefetch = 0 : i64, scratch_operands = 0 : i64, tpu.core_type = #tpu.core_type<tc>, window_params = [{transform_indices = @transform_0, window_bounds = array<i64: 1, 4, 256>}, {pipeline_mode = #tpu.pipeline_mode<synchronous>, transform_indices = @transform_1, window_bounds = array<i64: 2, 4>}, {pipeline_mode = #tpu.pipeline_mode<synchronous>, transform_indices = @transform_2, window_bounds = array<i64: 2, 1>}, {pipeline_mode = #tpu.pipeline_mode<synchronous>, transform_indices = @transform_3, window_bounds = array<i64: 4, 2>}, {pipeline_mode = #tpu.pipeline_mode<synchronous>, transform_indices = @transform_4, window_bounds = array<i64: 4, 1>}, {pipeline_mode = #tpu.pipeline_mode<synchronous>, transform_indices = @transform_5, window_bounds = array<i64: 2, 4>}, {pipeline_mode = #tpu.pipeline_mode<synchronous>, transform_indices = @transform_6, window_bounds = array<i64: 2, 1>}, {pipeline_mode = #tpu.pipeline_mode<synchronous>, transform_indices = @transform_7, window_bounds = array<i64: 4, 2>}, {pipeline_mode = #tpu.pipeline_mode<synchronous>, transform_indices = @transform_8, window_bounds = array<i64: 4, 1>}, {transform_indices = @transform_9, window_bounds = array<i64: 1, 4, 256>}]} {
    %c0 = arith.constant 0 : index
    %c0_0 = arith.constant 0 : index
    %c0_1 = arith.constant 0 : index
    %0 = vector.load %arg1[%c0, %c0_0, %c0_1] : memref<1x4x256xf32, #tpu.memory_space<vmem>>, vector<1x4x256xf32>
    %1 = vector.shape_cast %0 : vector<1x4x256xf32> to vector<4x256xf32>
    %cst = arith.constant dense<0.000000e+00> : vector<4xf32>
    %2 = vector.multi_reduction <add>, %1, %cst [1] : vector<4x256xf32> to vector<4xf32>
    %3 = vector.shape_cast %2 : vector<4xf32> to vector<4x1xf32>
    %cst_2 = arith.constant 3.906250e-03 : f32
    %4 = vector.broadcast %cst_2 : f32 to vector<4x1xf32>
    %5 = arith.mulf %3, %4 : vector<4x1xf32>
    %6 = vector.shape_cast %5 : vector<4x1xf32> to vector<4x1xf32>
    %7 = vector.broadcast %6 : vector<4x1xf32> to vector<4x128xf32>
    %c0_3 = arith.constant 0 : index
    %c0_4 = arith.constant 0 : index
    %8 = vector.load %arg6[%c0_3, %c0_4] : memref<2x4xf32, #tpu.memory_space<vmem>>, vector<2x4xf32>
    %cst_5 = arith.constant dense<0.000000e+00> : vector<2x128xf32>
    %9 = tpu.matmul %8, %7, %cst_5 {dimension_numbers = #tpu.dot_dimension_numbers<[1], [0], [0], [1], [0, 0, 1, 1], [], []>, precision = #tpu.contract_precision<fp32>} : vector<2x4xf32>, vector<4x128xf32>, vector<2x128xf32> -> vector<2x128xf32>
    %c0_6 = arith.constant 0 : index
    %c0_7 = arith.constant 0 : index
    %10 = vector.load %arg7[%c0_6, %c0_7] : memref<2x1xf32, #tpu.memory_space<vmem>>, vector<2x1xf32>
    %11 = vector.broadcast %10 : vector<2x1xf32> to vector<2x128xf32>
    %12 = arith.addf %9, %11 : vector<2x128xf32>
    %cst_8 = arith.constant 0.000000e+00 : f32
    %13 = vector.broadcast %cst_8 : f32 to vector<2x128xf32>
    %14 = arith.maximumf %12, %13 : vector<2x128xf32>
    %c0_9 = arith.constant 0 : index
    %c0_10 = arith.constant 0 : index
    %15 = vector.load %arg8[%c0_9, %c0_10] : memref<4x2xf32, #tpu.memory_space<vmem>>, vector<4x2xf32>
    %cst_11 = arith.constant dense<0.000000e+00> : vector<4x128xf32>
    %16 = tpu.matmul %15, %14, %cst_11 {dimension_numbers = #tpu.dot_dimension_numbers<[1], [0], [0], [1], [0, 0, 1, 1], [], []>, precision = #tpu.contract_precision<fp32>} : vector<4x2xf32>, vector<2x128xf32>, vector<4x128xf32> -> vector<4x128xf32>
    %c0_12 = arith.constant 0 : index
    %c0_13 = arith.constant 0 : index
    %17 = vector.load %arg9[%c0_12, %c0_13] : memref<4x1xf32, #tpu.memory_space<vmem>>, vector<4x1xf32>
    %18 = vector.broadcast %17 : vector<4x1xf32> to vector<4x128xf32>
    %19 = arith.addf %16, %18 : vector<4x128xf32>
    %20 = vector.extract_strided_slice %19 {offsets = [0, 0], sizes = [4, 1], strides = [1, 1]} : vector<4x128xf32> to vector<4x1xf32>
    %c0_14 = arith.constant 0 : index
    %c0_15 = arith.constant 0 : index
    %21 = vector.load %arg2[%c0_14, %c0_15] : memref<2x4xf32, #tpu.memory_space<vmem>>, vector<2x4xf32>
    %cst_16 = arith.constant dense<0.000000e+00> : vector<2x256xf32>
    %22 = tpu.matmul %21, %1, %cst_16 {dimension_numbers = #tpu.dot_dimension_numbers<[1], [0], [0], [1], [0, 0, 1, 1], [], []>, precision = #tpu.contract_precision<fp32>} : vector<2x4xf32>, vector<4x256xf32>, vector<2x256xf32> -> vector<2x256xf32>
    %c0_17 = arith.constant 0 : index
    %c0_18 = arith.constant 0 : index
    %23 = vector.load %arg3[%c0_17, %c0_18] : memref<2x1xf32, #tpu.memory_space<vmem>>, vector<2x1xf32>
    %24 = vector.broadcast %23 : vector<2x1xf32> to vector<2x256xf32>
    %25 = arith.addf %22, %24 : vector<2x256xf32>
    %cst_19 = arith.constant 0.000000e+00 : f32
    %26 = vector.broadcast %cst_19 : f32 to vector<2x256xf32>
    %27 = arith.maximumf %25, %26 : vector<2x256xf32>
    %c0_20 = arith.constant 0 : index
    %c0_21 = arith.constant 0 : index
    %28 = vector.load %arg4[%c0_20, %c0_21] : memref<4x2xf32, #tpu.memory_space<vmem>>, vector<4x2xf32>
    %cst_22 = arith.constant dense<0.000000e+00> : vector<4x256xf32>
    %29 = tpu.matmul %28, %27, %cst_22 {dimension_numbers = #tpu.dot_dimension_numbers<[1], [0], [0], [1], [0, 0, 1, 1], [], []>, precision = #tpu.contract_precision<fp32>} : vector<4x2xf32>, vector<2x256xf32>, vector<4x256xf32> -> vector<4x256xf32>
    %c0_23 = arith.constant 0 : index
    %c0_24 = arith.constant 0 : index
    %30 = vector.load %arg5[%c0_23, %c0_24] : memref<4x1xf32, #tpu.memory_space<vmem>>, vector<4x1xf32>
    %31 = vector.broadcast %30 : vector<4x1xf32> to vector<4x256xf32>
    %32 = arith.addf %29, %31 : vector<4x256xf32>
    %33 = vector.broadcast %20 : vector<4x1xf32> to vector<4x256xf32>
    %34 = arith.addf %32, %33 : vector<4x256xf32>
    %35 = arith.negf %34 : vector<4x256xf32>
    %36 = math.exp %35 : vector<4x256xf32>
    %cst_25 = arith.constant 1.000000e+00 : f32
    %37 = vector.broadcast %cst_25 : f32 to vector<4x256xf32>
    %38 = arith.addf %37, %36 : vector<4x256xf32>
    %39 = arith.divf %37, %38 : vector<4x256xf32>
    %c0_26 = arith.constant 0 : index
    %c0_27 = arith.constant 0 : index
    %c0_28 = arith.constant 0 : index
    %40 = vector.load %arg1[%c0_26, %c0_27, %c0_28] : memref<1x4x256xf32, #tpu.memory_space<vmem>>, vector<1x4x256xf32>
    %41 = vector.shape_cast %40 : vector<1x4x256xf32> to vector<4x256xf32>
    %42 = arith.mulf %41, %39 : vector<4x256xf32>
    %c0_29 = arith.constant 0 : index
    %c0_30 = arith.constant 0 : index
    %c0_31 = arith.constant 0 : index
    %43 = vector.load %arg10[%c0_29, %c0_30, %c0_31] : memref<1x4x256xf32, #tpu.memory_space<vmem>>, vector<1x4x256xf32>
    %44 = vector.shape_cast %43 : vector<1x4x256xf32> to vector<4x256xf32>
    %45 = vector.shape_cast %42 : vector<4x256xf32> to vector<1x4x256xf32>
    tpu.vector_store %arg10[%c0_29, %c0_30, %c0_31], %45 {strides = array<i32>} : memref<1x4x256xf32, #tpu.memory_space<vmem>>, vector<1x4x256xf32>,
    return
  }
  func.func @transform_0(%arg0: i32) -> (i32, i32, i32) {
    %c0_i32 = arith.constant 0 : i32
    %c0_i32_0 = arith.constant 0 : i32
    %c0_i32_1 = arith.constant 0 : i32
    return %arg0, %c0_i32, %c0_i32_0 : i32, i32, i32
  }
  func.func @transform_1(%arg0: i32) -> (i32, i32) {
    %c0_i32 = arith.constant 0 : i32
    %c0_i32_0 = arith.constant 0 : i32
    %c0_i32_1 = arith.constant 0 : i32
    return %c0_i32, %c0_i32_0 : i32, i32
  }
  func.func @transform_2(%arg0: i32) -> (i32, i32) {
    %c0_i32 = arith.constant 0 : i32
    %c0_i32_0 = arith.constant 0 : i32
    %c0_i32_1 = arith.constant 0 : i32
    return %c0_i32, %c0_i32_0 : i32, i32
  }
  func.func @transform_3(%arg0: i32) -> (i32, i32) {
    %c0_i32 = arith.constant 0 : i32
    %c0_i32_0 = arith.constant 0 : i32
    %c0_i32_1 = arith.constant 0 : i32
    return %c0_i32, %c0_i32_0 : i32, i32
  }
  func.func @transform_4(%arg0: i32) -> (i32, i32) {
    %c0_i32 = arith.constant 0 : i32
    %c0_i32_0 = arith.constant 0 : i32
    %c0_i32_1 = arith.constant 0 : i32
    return %c0_i32, %c0_i32_0 : i32, i32
  }
  func.func @transform_5(%arg0: i32) -> (i32, i32) {
    %c0_i32 = arith.constant 0 : i32
    %c0_i32_0 = arith.constant 0 : i32
    %c0_i32_1 = arith.constant 0 : i32
    return %c0_i32, %c0_i32_0 : i32, i32
  }
  func.func @transform_6(%arg0: i32) -> (i32, i32) {
    %c0_i32 = arith.constant 0 : i32
    %c0_i32_0 = arith.constant 0 : i32
    %c0_i32_1 = arith.constant 0 : i32
    return %c0_i32, %c0_i32_0 : i32, i32
  }
  func.func @transform_7(%arg0: i32) -> (i32, i32) {
    %c0_i32 = arith.constant 0 : i32
    %c0_i32_0 = arith.constant 0 : i32
    %c0_i32_1 = arith.constant 0 : i32
    return %c0_i32, %c0_i32_0 : i32, i32
  }
  func.func @transform_8(%arg0: i32) -> (i32, i32) {
    %c0_i32 = arith.constant 0 : i32
    %c0_i32_0 = arith.constant 0 : i32
    %c0_i32_1 = arith.constant 0 : i32
    return %c0_i32, %c0_i32_0 : i32, i32
  }
  func.func @transform_9(%arg0: i32) -> (i32, i32, i32) {
    %c0_i32 = arith.constant 0 : i32
    %c0_i32_0 = arith.constant 0 : i32
    %c0_i32_1 = arith.constant 0 : i32
    return %arg0, %c0_i32, %c0_i32_0 : i32, i32, i32
  }
}

</mosaic_0001>

<bundles_post_ra>
// kernel: tpu_custom_call.1
= control target key start
LH: loop header
LB: loop body
LE: loop exit
PB: predicated region body
PF: predicated region fallthrough
CT: control target
= control target key end

     0   :  { %14 = vsyncpa [#allocation3], 0  ;;  %s2833_s0 = inlined_call_operand.vmem [shape: f32[2,4,256], index: 0, kind: input, shape index: {}]   ;;  %s2834_s1 = inlined_call_operand.vmem [shape: f32[2,4], index: 1, kind: input, shape index: {}]   ;;  %s2835_s2 = inlined_call_operand.vmem [shape: f32[2,1], index: 2, kind: input, shape index: {}]   ;;  %s2836_s3 = inlined_call_operand.vmem [shape: f32[4,2], index: 3, kind: input, shape index: {}]   ;;  %s2837_s4 = inlined_call_operand.vmem [shape: f32[4,1], index: 4, kind: input, shape index: {}]   ;;  %s2838_s5 = inlined_call_operand.vmem [shape: f32[2,4], index: 5, kind: input, shape index: {}]   ;;  %s2839_s6 = inlined_call_operand.vmem [shape: f32[2,1], index: 6, kind: input, shape index: {}]   ;;  %s2840_s7 = inlined_call_operand.vmem [shape: f32[4,2], index: 7, kind: input, shape index: {}]   ;;  %s2841_s8 = inlined_call_operand.vmem [shape: f32[4,1], index: 8, kind: input, shape index: {}]   ;;  %s2842_s9 = inlined_call_operand.hbm [shape: f32[2,4,256], index: 9, kind: output, shape index: {}]  }
   0x1   :  { %16 = vsyncpa [#allocation3 + $0x1], 0  ;;  %s2642_s30 = smov 0   ;;  %s2644_s10 = smov 0  }
   0x2   :  { %s2646_s11 = smov 0   ;;  %s2648_s12 = smov 0  }
   0x3 LB: > { %s2663_s13 = sadd.s32 4294967295, %s2586_s12   ;;  %s2325_s14 = sadd.s32 4294967294, %s2586_s12   ;;  %s2586_s12 = sphi %s2648_s12, %s2848_s12   ;;  %s2582_s11 = sphi %s2646_s11, %s2847_s11   ;;  %s2578_s10 = sphi %s2644_s10, %s2846_s10   ;;  %s2574_s30 = sphi %s2642_s30, %s2845_s30  }
   0x4   : > { %s2667_s15 = sadd.s32 1, %s2586_s12   ;;  %s223_s16 = sadd.s32 1, %s2582_s11 }
   0x5   : > { %s220_s17 = ssub.s32 %s2586_s12, %s2667_s15  ;;  %p233_p0 = scmp.ne.s32.totalorder %s2582_s11, %s2578_s10 }
   0x6   : > { %p221_p1 = scmp.eq.s32.totalorder %s220_s17, 0  ;;  %p234_p2 = scmp.eq.s32.totalorder %s2663_s13, 1 }
   0x7   : > { %p239_p3 = scmp.ne.s32.totalorder %s2578_s10, %s2574_s30  ;;  %p240_p4 = scmp.eq.s32.totalorder %s2325_s14, 1 }
   0x8   : > { %s2678_s18 = scalar_select %p221_p1, %s2582_s11, %s223_s16  }
   0x9   : > { %p2680_p5 = por %p234_p2, %p233_p0  ;;  %p2684_p6 = por %p240_p4, %p239_p3 }
   0xa   : > { %p2328_p7 = scmp.ge.s32.totalorder %s2586_s12, 1  ;;  %p290_p8 = scmp.lt.s32.totalorder %s2586_s12, 3 }
   0xc   : > { %p291_p9 = pnand %p2328_p7, %p290_p8 }
   0xd   : > { %p326_p10 = scmp.lt.s32.totalorder (!%p291_p9), %s2663_s13, 1  ;;  %vm335_vm0 = vcmask (!%p291_p9), 1043456   ;;  %v2588_v5 = vmov (!%p291_p9), 0.0   ;;  %vm2589_vm1 = vmmov (!%p291_p9), 0   ;;  %v343_v6 = vld [vmem:[%s2839_s6] sm:$0x3] (!%p291_p9) }
   0xe   : > { %294 = sbr.rel (%p291_p9) target bundleno = 868 (0x364), region = 56  ;;  %2365 = vmatprep.subr.mxu0 (!%p291_p9), %v2588_v5  ;;  %2395 = vmatprep.subr.mxu1 (!%p291_p9), %v2588_v5  ;;  %v1265_v7 = vld [vmem:[%s2835_s2] sm:$0x3] (!%p291_p9)  ;;  %v2590_v8 = vmov (!%p291_p9), 0   ;;  %vm349_vm2 = vcmask (!%p291_p9), 31744   ;;  %vm810_vm3 = vcmask (!%p291_p9), 15360  }
   0xf   : > { %2367 = vmatprep.mubr.msk.f32.mxu0 (!%p291_p9), %vm2589_vm1, %v2588_v5  ;;  %2397 = vmatprep.mubr.msk.f32.mxu1 (!%p291_p9), %vm2589_vm1, %v2588_v5  ;;  %v804_v9 = vld [vmem:[%s2841_s8] sm:$0xf] (!%p291_p9)  ;;  %vm814_vm4 = vcmask (!%p291_p9), 1041408   ;;  %s323_s14 = sand.u32 (!%p291_p9), 1, %s2578_s10   ;;  %s2340_s17 = sshll.u32 (!%p291_p9), %s2663_s13, 7 }
  0x10   : > { %2513 = vset.pattern.permute.xlu0 (!%p291_p9), %v2590_v8  ;;  %2514 = vset.pattern.permute.xlu1 (!%p291_p9), %v2590_v8  ;;  %v1746_v10 = vld [vmem:[%s2837_s4] sm:$0xf] (!%p291_p9)  ;;  %s2329_s16 = sshll.u32 (!%p291_p9), %s323_s14, 3  ;;  %s2252_s26 = scalar_lea.sflag (!%p291_p9), [#allocation3], %s323_s14 }
  0x11   : > { %1268 = vperm.xlu1 (!%p291_p9), %2514, %v1265_v7   ;;  %v342_v11 = vld [vmem:[%s2838_s5] sm:$0x3] (!%p291_p9) }
  0x12   : > { %v351_v12 = vsel (!%p291_p9), %vm349_vm2, %v342_v11, 0  ;;  %v1264_v26 = vld [vmem:[%s2834_s1] sm:$0x3] (!%p291_p9) }
  0x13   : > { %v422_v13 = vand.u32 (!%p291_p9), 4294901760, %v351_v12  ;;  %v1272_v28 = vsel (!%p291_p9), %vm349_vm2, %v1264_v26, 0  ;;  %v803_v45 = vld [vmem:[%s2840_s7] sm:$0xf] (!%p291_p9) }
  0x14   : > { %v1345_v31 = vand.u32 (!%p291_p9), 4294901760, %v1272_v28  ;;  %v812_v46 = vsel (!%p291_p9), %vm810_vm3, %v803_v45, 0  ;;  %v1745_v63 = vld [vmem:[%s2836_s3] sm:$0xf] (!%p291_p9) }
  0x15   : > { %s327_s21 = scalar_select %p326_p10, %s2663_s13, 1  ;;  %807 = vperm.xlu1 %2514, %v804_v9   ;;  %v423_v14 = vsub.f32 %v351_v12, %v422_v13  ;;  %v884_v47 = vand.u32 4294901760, %v812_v46 }
  0x16   : > { %v1346_v34 = vsub.f32 %v1272_v28, %v1345_v31  ;;  %s2591_s13 = smov [#allocation2]  }
  0x17   : > { %s2339_s22 = sshll.u32 %s327_s21, 3  ;;  %v424_v15 = vand.u32 4294901760, %v423_v14  ;;  %v885_v48 = vsub.f32 %v812_v46, %v884_v47  ;;  %s325_s21 = scalar_lea.vmem [#allocation2], %s2329_s16 }
  0x18   : > { %s330_s25 = scalar_lea.vmem %s2833_s0, %s2339_s22  ;;  %v1347_v37 = vand.u32 4294901760, %v1346_v34  ;;  %s2266_s22 = sshll.u32 %s325_s21, 4  ;;  %s2793_s22 = int_to_ptr.vmem [resolvable:$true] %s2266_s22 }
  0x19   : > { %v2695_v0 = vld [vmem:[%s330_s25] sm:$0xff]  ;;  %1749 = vperm.xlu1 %2514, %v1746_v10   ;;  %v425_v16 = vsub.f32 %v423_v14, %v424_v15  ;;  %v886_v49 = vand.u32 4294901760, %v885_v48  ;;  %s2791_s25 = scalar_lea.hbm %s2842_s9, %s2340_s17  ;;  %s2524_s27 = scalar_lea.vmem %s2793_s22, 128 }
  0x1a   : > { %v333_v1 = vcombine.high %v2695_v0, %v2695_v0  ;;  %v336_v2 = vsel %vm335_vm0, %v2695_v0, 0.0  ;;  %v1274_v30 = vsel %vm335_vm0, %v2695_v0, 0  ;;  %v1348_v40 = vsub.f32 %v1346_v34, %v1347_v37  ;;  %p2525_p11 = scmp.ne.s32.totalorder %s2793_s22, %s2524_s27  ;;  %s2528_s28 = sshll.u32 %s2591_s13, 4  ;;  %s2529_s28 = int_to_ptr.vmem [resolvable:$false] %s2528_s28 }
  0x1b   : > { %v426_v20 = vand.u32 4294901760, %v425_v16  ;;  %v1280_v32 = vand.u32 4294901760, %v1274_v30  ;;  %v887_v54 = vsub.f32 %v885_v48, %v886_v49  ;;  %s2530_s29 = scalar_lea.vmem %s2529_s28, 256  ;;  %p2531_p0 = scmp.lt.s32.totalorder %s2793_s22, %s2529_s28 }
  0x1c   : > { %v337_v3 = vsel %vm335_vm0, %v333_v1, 0.0  ;;  %v1276_v27 = vsel %vm335_vm0, %v333_v1, 0  ;;  %v1349_v43 = vand.u32 4294901760, %v1348_v40  ;;  %v1753_v1 = vsel %vm810_vm3, %v1745_v63, 0  ;;  %p2526_p12 = pnand %p2525_p11, %p2680_p5  ;;  %p2532_p1 = scmp.lt.s32.totalorder %s2530_s29, %s2524_s27 }
  0x1d   : > { %v338_v4 = vadd.f32 %v337_v3, %v336_v2  ;;  %v1278_v29 = vand.u32 4294901760, %v1276_v27  ;;  %v1363_v35 = vsub.f32 %v1274_v30, %v1280_v32  ;;  %v888_v57 = vand.u32 4294901760, %v887_v54 }
  0x1e   : > { %v1828_v2 = vand.u32 4294901760, %v1753_v1  ;;  %p2527_p13 = pneg %p2526_p12  ;;  %p2533_p2 = por %p2532_p1, %p2531_p0 }
  0x1f   : > { %339 = vadd.xlane.f32.xlu0 %v338_v4  ;;  %v1357_v33 = vsub.f32 %v1276_v27, %v1278_v29  ;;  %v1364_v38 = vand.u32 4294901760, %v1363_v35 }
  0x20   : > { %v1829_v3 = vsub.f32 %v1753_v1, %v1828_v2  ;;  %p2534_p3 = pnand %p2533_p2, %p2527_p13 }
  0x21   : > { %v1358_v36 = vand.u32 4294901760, %v1357_v33  ;;  %v1365_v41 = vsub.f32 %v1363_v35, %v1364_v38 }
  0x23   : > { %v1359_v39 = vsub.f32 %v1357_v33, %v1358_v36  ;;  %v1366_v44 = vand.u32 4294901760, %v1365_v41 }
  0x25   : > { %v1360_v42 = vand.u32 4294901760, %v1359_v39 }
  0x35   : > { %346 = vperm.xlu0 %2513, %v343_v6   ;;  %v1830_v6 = vand.u32 4294901760, %v1829_v3 }
  0x37   : > { %v1831_v12 = vsub.f32 %v1829_v3, %v1830_v6 }
  0x90   : > { %v1269_v4 = vpop.permute.xlu1 %1268 }
  0x94   : > { %v808_v27 = vpop.permute.xlu1 %807 }
  0xac   : > { %v340_v17 = vpop.xlane.xlu0 %339 }
  0xad   : > { %v341_v18 = vmul.f32 0.00390625, %v340_v17 }
  0xaf   : > { %v354_v19 = vsel %vm335_vm0, %v341_v18, 0  ;;  %v1832_v18 = vand.u32 4294901760, %v1831_v12 }
  0xb0   : > { %v357_v21 = vand.u32 4294901760, %v354_v19 }
  0xb2   : > { %v434_v22 = vsub.f32 %v354_v19, %v357_v21  ;;  %2366 = vmatpush3.msra.mxu0 %v357_v21 }
  0xb3   : > { %2368 = vmatmul.mubr.f32.vlgmr.msra.gmra.mrb[0].mxu0 %v426_v20  ;;  %2370 = vmatprep.subr.mxu0 %v2588_v5 }
  0xb4   : > { %v435_v23 = vand.u32 4294901760, %v434_v22  ;;  %2372 = vmatprep.mubr.msk.f32.mxu0 %vm2589_vm1, %v2588_v5  ;;  %v347_v50 = vpop.permute.xlu0 %346 }
  0xb6   : > { %v436_v24 = vsub.f32 %v434_v22, %v435_v23 }
  0xb8   : > { %v437_v25 = vand.u32 4294901760, %v436_v24 }
  0xba   : > { %2371 = vmatpush3.msra.mxu0 %v437_v25 }
  0xbb   : > { %2373 = vmatmul.mubr.f32.vlgmr.msra.gmra.mrb[0].mxu0 %v422_v13  ;;  %2375 = vmatprep.subr.mxu0 %v2588_v5 }
  0xbc   : > { %2376 = vmatpush3.msra.mxu0 %v434_v22  ;;  %2377 = vmatprep.mubr.msk.f32.mxu0 %vm2589_vm1, %v2588_v5 }
  0xbd   : > { %2380 = vmatprep.subr.mxu0 %v2588_v5 }
  0xc3   : > { %2378 = vmatmul.mubr.f32.vlgmr.msra.gmra.mrb[0].mxu0 %v423_v14 }
  0xc4   : > { %2381 = vmatpush3.msra.mxu0 %v357_v21  ;;  %2382 = vmatprep.mubr.msk.f32.mxu0 %vm2589_vm1, %v2588_v5 }
  0xc5   : > { %2385 = vmatprep.subr.mxu0 %v2588_v5 }
  0xcb   : > { %2383 = vmatmul.mubr.f32.vlgmr.msra.gmra.mrb[0].mxu0 %v424_v15 }
  0xcc   : > { %2386 = vmatpush3.msra.mxu0 %v435_v23  ;;  %2387 = vmatprep.mubr.msk.f32.mxu0 %vm2589_vm1, %v2588_v5 }
  0xcd   : > { %2390 = vmatprep.subr.mxu0 %v2588_v5 }
  0xd3   : > { %2388 = vmatmul.mubr.f32.vlgmr.msra.gmra.mrb[0].mxu0 %v422_v13 }
  0xd4   : > { %2391 = vmatpush3.msra.mxu0 %v357_v21  ;;  %2392 = vmatprep.mubr.msk.f32.mxu0 %vm2589_vm1, %v2588_v5 }
  0xd5   : > { %1279 = vmatprep.subr.mxu0 %v1278_v29 }
  0xdb   : > { %2393 = vmatmul.mubr.f32.vlgmr.msra.gmra.mrb[0].mxu0 %v422_v13 }
  0xdc   : > { %1281 = vmatpush1.msra.mxu0 %v1280_v32  ;;  %1344 = vmatprep.mubr.f32.mxu0 %v2588_v5 }
  0xdd   : > { %1361 = vmatprep.subr.mxu0 %v1360_v42 }
  0xdf   : > { %1350 = vmatmul.mubr.f32.vlgmr.msra.gmra.mrb[2].mxu0 %v1349_v43 }
  0xe0   : > { %1367 = vmatpush1.msra.mxu0 %v1366_v44  ;;  %1430 = vmatprep.mubr.f32.mxu0 %v2588_v5 }
  0xe1   : > { %1440 = vmatprep.subr.mxu0 %v1357_v33  ;;  %v1750_v33 = vpop.permute.xlu1 %1749 }
  0xe7   : > { %1432 = vmatmul.mubr.f32.vlgmr.msra.gmra.mrb[2].mxu0 %v1345_v31 }
  0xe8   : > { %1443 = vmatpush1.msra.mxu0 %v1363_v35  ;;  %1506 = vmatprep.mubr.f32.mxu0 %v2588_v5 }
  0xe9   : > { %1516 = vmatprep.subr.mxu0 %v1278_v29 }
  0xef   : > { %1509 = vmatmul.mubr.f32.vlgmr.msra.gmra.mrb[2].mxu0 %v1346_v34 }
  0xf0   : > { %1518 = vmatpush1.msra.mxu0 %v1280_v32  ;;  %1581 = vmatprep.mubr.f32.mxu0 %v2588_v5 }
  0xf1   : > { %1594 = vmatprep.subr.mxu0 %v1358_v36 }
  0xf7   : > { %1585 = vmatmul.mubr.f32.vlgmr.msra.gmra.mrb[2].mxu0 %v1347_v37 }
  0xf8   : > { %1598 = vmatpush1.msra.mxu0 %v1364_v38  ;;  %1661 = vmatprep.mubr.f32.mxu0 %v2588_v5 }
  0xf9   : > { %1670 = vmatprep.subr.mxu0 %v1278_v29 }
  0xff   : > { %1663 = vmatmul.mubr.f32.vlgmr.msra.gmra.mrb[2].mxu0 %v1345_v31 }
 0x100   : > { %1672 = vmatpush1.msra.mxu0 %v1280_v32  ;;  %1735 = vmatprep.mubr.f32.mxu0 %v2588_v5 }
 0x107   : > { %1737 = vmatmul.mubr.f32.vlgmr.msra.gmra.mrb[2].mxu0 %v1345_v31 }
 0x1ae   : > { %v798_v51 = vpop.f32.mrb[0].mxu0 }
 0x1af   : > { %v2425_v52 = vadd.f32 %v798_v51, %v347_v50  ;;  %v2394_v53 = vpop.f32.mrb[1].mxu0 }
 0x1b1   : > { %v802_v55 = vmax.f32 %v2425_v52, 0.0 }
 0x1b3   : > { %v816_v56 = vsel %vm814_vm4, %v802_v55, 0 }
 0x1b4   : > { %v819_v58 = vand.u32 4294901760, %v816_v56 }
 0x1b6   : > { %v896_v59 = vsub.f32 %v816_v56, %v819_v58  ;;  %2396 = vmatpush3.msra.mxu1 %v819_v58 }
 0x1b7   : > { %2398 = vmatmul.mubr.f32.vlgmr.msra.gmra.mrb[0].mxu1 %v888_v57  ;;  %2400 = vmatprep.subr.mxu1 %v2588_v5 }
 0x1b8   : > { %v897_v60 = vand.u32 4294901760, %v896_v59  ;;  %2402 = vmatprep.mubr.msk.f32.mxu1 %vm2589_vm1, %v2588_v5 }
 0x1ba   : > { %v898_v61 = vsub.f32 %v896_v59, %v897_v60 }
 0x1bc   : > { %v899_v62 = vand.u32 4294901760, %v898_v61 }
 0x1be   : > { %2401 = vmatpush3.msra.mxu1 %v899_v62 }
 0x1bf   : > { %2403 = vmatmul.mubr.f32.vlgmr.msra.gmra.mrb[0].mxu1 %v884_v47  ;;  %2405 = vmatprep.subr.mxu1 %v2588_v5 }
 0x1c0   : > { %2406 = vmatpush3.msra.mxu1 %v896_v59  ;;  %2407 = vmatprep.mubr.msk.f32.mxu1 %vm2589_vm1, %v2588_v5 }
 0x1c1   : > { %2410 = vmatprep.subr.mxu1 %v2588_v5 }
 0x1c7   : > { %2408 = vmatmul.mubr.f32.vlgmr.msra.gmra.mrb[0].mxu1 %v885_v48 }
 0x1c8   : > { %2411 = vmatpush3.msra.mxu1 %v819_v58  ;;  %2412 = vmatprep.mubr.msk.f32.mxu1 %vm2589_vm1, %v2588_v5 }
 0x1c9   : > { %2415 = vmatprep.subr.mxu1 %v2588_v5 }
 0x1cf   : > { %2413 = vmatmul.mubr.f32.vlgmr.msra.gmra.mrb[0].mxu1 %v886_v49 }
 0x1d0   : > { %2416 = vmatpush3.msra.mxu1 %v897_v60  ;;  %2417 = vmatprep.mubr.msk.f32.mxu1 %vm2589_vm1, %v2588_v5 }
 0x1d1   : > { %2420 = vmatprep.subr.mxu1 %v2588_v5 }
 0x1d7   : > { %2418 = vmatmul.mubr.f32.vlgmr.msra.gmra.mrb[0].mxu1 %v884_v47 }
 0x1d8   : > { %2421 = vmatpush3.msra.mxu1 %v819_v58  ;;  %2422 = vmatprep.mubr.msk.f32.mxu1 %vm2589_vm1, %v2588_v5 }
 0x1da   : > { %v1738_v7 = vpop.f32.mrb[2].mxu0 }
 0x1db   : > { %v2427_v8 = vadd.f32 %v1738_v7, %v1269_v4  ;;  %v1740_v9 = vpop.f32.mrb[3].mxu0 }
 0x1dc   : > { %v2428_v10 = vadd.f32 %v1740_v9, %v1269_v4 }
 0x1dd   : > { %v1743_v11 = vmax.f32 %v2427_v8, 0.0 }
 0x1de   : > { %v1744_v13 = vmax.f32 %v2428_v10, 0.0 }
 0x1df   : > { %v1756_v14 = vsel %vm814_vm4, %v1743_v11, 0  ;;  %2423 = vmatmul.mubr.f32.vlgmr.msra.gmra.mrb[0].mxu1 %v884_v47 }
 0x1e0   : > { %v1763_v15 = vand.u32 4294901760, %v1756_v14  ;;  %v1759_v16 = vsel %vm814_vm4, %v1744_v13, 0  ;;  %1827 = vmatprep.mubr.f32.mxu1 %v2588_v5 }
 0x1e1   : > { %v1761_v17 = vand.u32 4294901760, %v1759_v16 }
 0x1e2   : > { %v1846_v19 = vsub.f32 %v1756_v14, %v1763_v15 }
 0x1e3   : > { %v1840_v20 = vsub.f32 %v1759_v16, %v1761_v17  ;;  %1762 = vmatprep.subr.mxu1 %v1761_v17 }
 0x1e4   : > { %v1847_v21 = vand.u32 4294901760, %v1846_v19  ;;  %1764 = vmatpush1.msra.mxu1 %v1763_v15 }
 0x1e5   : > { %1833 = vmatmul.mubr.f32.vlgmr.msra.gmra.mrb[2].mxu1 %v1832_v18  ;;  %v1841_v22 = vand.u32 4294901760, %v1840_v20 }
 0x1e6   : > { %v1848_v23 = vsub.f32 %v1846_v19, %v1847_v21  ;;  %1913 = vmatprep.mubr.f32.mxu1 %v2588_v5 }
 0x1e7   : > { %v1842_v24 = vsub.f32 %v1840_v20, %v1841_v22 }
 0x1e8   : > { %v1849_v25 = vand.u32 4294901760, %v1848_v23 }
 0x1e9   : > { %v1843_v26 = vand.u32 4294901760, %v1842_v24 }
 0x1eb   : > { %1844 = vmatprep.subr.mxu1 %v1843_v26 }
 0x1ec   : > { %1850 = vmatpush1.msra.mxu1 %v1849_v25 }
 0x1ed   : > { %1915 = vmatmul.mubr.f32.vlgmr.msra.gmra.mrb[2].mxu1 %v1828_v2  ;;  %1923 = vmatprep.subr.mxu1 %v1840_v20 }
 0x1ee   : > { %1926 = vmatpush1.msra.mxu1 %v1846_v19  ;;  %1989 = vmatprep.mubr.f32.mxu1 %v2588_v5 }
 0x1ef   : > { %1999 = vmatprep.subr.mxu1 %v1761_v17 }
 0x1f5   : > { %1992 = vmatmul.mubr.f32.vlgmr.msra.gmra.mrb[2].mxu1 %v1829_v3 }
 0x1f6   : > { %2001 = vmatpush1.msra.mxu1 %v1763_v15  ;;  %2064 = vmatprep.mubr.f32.mxu1 %v2588_v5 }
 0x1f7   : > { %2077 = vmatprep.subr.mxu1 %v1841_v22 }
 0x1fd   : > { %2068 = vmatmul.mubr.f32.vlgmr.msra.gmra.mrb[2].mxu1 %v1830_v6 }
 0x1fe   : > { %2081 = vmatpush1.msra.mxu1 %v1847_v21  ;;  %2144 = vmatprep.mubr.f32.mxu1 %v2588_v5 }
 0x1ff   : > { %2153 = vmatprep.subr.mxu1 %v1761_v17 }
 0x205   : > { %2146 = vmatmul.mubr.f32.vlgmr.msra.gmra.mrb[2].mxu1 %v1828_v2 }
 0x206   : > { %2155 = vmatpush1.msra.mxu1 %v1763_v15  ;;  %2218 = vmatprep.mubr.f32.mxu1 %v2588_v5 }
 0x20d   : > { %2220 = vmatmul.mubr.f32.vlgmr.msra.gmra.mrb[2].mxu1 %v1828_v2 }
 0x2b2   : > { %v1260_v28 = vpop.f32.mrb[0].mxu1 }
 0x2b3   : > { %v2426_v29 = vadd.f32 %v1260_v28, %v808_v27  ;;  %v2424_v30 = vpop.f32.mrb[1].mxu1 }
 0x2b5   : > { %2228 = vperm.xlu1 %2514, %v2426_v29  }
 0x2e0   : > { %v2221_v31 = vpop.f32.mrb[2].mxu1 }
 0x2e1   : > { %v2223_v32 = vpop.f32.mrb[3].mxu1  ;;  %v2429_v34 = vadd.f32 %v2221_v31, %v1750_v33 }
 0x2e2   : > { %v2430_v35 = vadd.f32 %v2223_v32, %v1750_v33 }
 0x334   : > { %v2229_v36 = vpop.permute.xlu1 %2228 }
 0x335   : > { %v2231_v37 = vadd.f32 %v2429_v34, %v2229_v36  ;;  %v2232_v38 = vadd.f32 %v2430_v35, %v2229_v36 }
 0x337   : > { %v2332_v39 = vmul.f32 -1.442695, %v2231_v37  ;;  %v2333_v40 = vmul.f32 -1.442695, %v2232_v38 }
 0x339   : > { %2516 = vpow2.f32 %v2332_v39 }
 0x33a   : > { %2518 = vpow2.f32 %v2333_v40 }
 0x343   : > { %v2517_v5 = vpop.eup %2516 }
 0x344   : > { %v2519_v41 = vpop.eup %2518  ;;  %v2239_v42 = vadd.f32 1.0, %v2517_v5 }
 0x345   : > { %v2240_v43 = vadd.f32 1.0, %v2519_v41 }
 0x346   : > { %2520 = vrcp.f32 %v2239_v42 }
 0x347   : > { %2522 = vrcp.f32 %v2240_v43 }
 0x350   : > { %v2521_v44 = vpop.eup %2520 }
 0x351   : > { %v2523_v45 = vpop.eup %2522 }
 0x352   : > { %v2247_v46 = vcombine.low %v2521_v44, %v2523_v45 }
 0x354   : > { %v2249_v47 = vmul.f32 %v2247_v46, %v2695_v0 }
 0x356   : > { %2250 = vst [vmem:[%s325_s21] sm:$0xff] %v2249_v47 }
 0x357   : > { %2537 = shalt.err (!%p2534_p3)
}
 0x358   : > { %s2538_s14 = scalar_lea.hbm %s2791_s25, 128  ;;  %s2542_s21 = scalar_lea.hbm %s2842_s9, 256 }
 0x359   : > { %p2539_p4 = scmp.ne.s32.totalorder %s2791_s25, %s2538_s14  ;;  %p2543_p9 = scmp.lt.u32.totalorder %s2791_s25, %s2842_s9 }
 0x35a   : > { %p2544_p10 = scmp.lt.u32.totalorder %s2542_s21, %s2538_s14  ;;  %p2546_p12 = scmp.lt.u32.totalorder %s2538_s14, %s2791_s25 }
 0x35b   : > { %p2540_p7 = pnand %p2539_p4, %p2680_p5 }
 0x35c   : > { %p2545_p11 = por %p2544_p10, %p2543_p9 }
 0x35d   : > { %p2541_p8 = pneg %p2540_p7 }
 0x35e   : > { %p2547_p13 = por %p2546_p12, %p2545_p11 }
 0x360   : > { %p2548_p0 = pnand %p2547_p13, %p2541_p8 }
 0x362   : > { %2551 = shalt.err (!%p2548_p0)
}
 0x363   : > { %2471 = dma.vmem_to_hbm [thread:$0]  (%p2680_p5), %s2793_s22, 128, %s2791_s25, %s2252_s26  }
 0x364 PF: > { %p2477_p1 = scmp.ge.s32.totalorder %s2586_s12, 2  ;;  %s2278_s27 = sand.u32 1, %s2574_s30  }
 0x365   : > { %s2279_s13 = scalar_lea.sflag [#allocation3], %s2278_s27 }
 0x366   : > { %p2474_p2 = pnand %p2477_p1, %p2684_p6 }
 0x368   : > { %2569 = dma.done.wait (!%p2474_p2), %s2279_s13, 128  }
 0x369   : > { %2571 = vsyncadd (!%p2474_p2), %s2279_s13, 4294967168  ;;  %p19_p3 = scmp.ge.s32.totalorder %s2667_s15, 4   ;;  %s2845_s30 = smov %s2578_s10 }
 0x36a   : > { %s2846_s10 = smov %s2582_s11  ;;  %s2847_s11 = smov %s2678_s18 }
 0x36b   : > { %s2848_s12 = smov %s2667_s15  ;;  %21 = sbr.rel (!%p19_p3) target bundleno = 3 (0x3), region = 91 }
 0x372   :  { %2284 = vsyncpa [#allocation3], 1 }
 0x373   :  { %2286 = vsyncpa [#allocation3 + $0x1], 1 }

</bundles_post_ra>
